<compile_context>
chip_gen: v5e
topology: v5e:2x2
jax: 0.10.0
libtpu: 0.0.40
codegen_flags: <defaults>
</compile_context>

<pallas_src>
import functools

import jax
import jax.numpy as jnp
from jax.experimental import pallas as pl
from jax.experimental.pallas import tpu as pltpu


def _layer_norm(x, gamma, beta, eps=1e-5):
    mu = jnp.mean(x, axis=-1, keepdims=True)
    var = jnp.mean(jnp.square(x - mu), axis=-1, keepdims=True)
    return (x - mu) * jax.lax.rsqrt(var + eps) * gamma + beta


# ----------------------------------------------------------------------------
# One kernel for the whole stack. Grid = (batch_tiles, depth):
#   axis 0 ("parallel")  : independent batch slabs (megacore-shardable on v7x)
#   axis 1 ("arbitrary") : layer index; per-layer weights streamed via index_map
# The residual stream lives in out_ref (constant block index along the layer
# axis => resident in VMEM across all layers, written back to HBM once).
# ----------------------------------------------------------------------------
def _transformer_stack_kernel(x_ref, ln1g_ref, ln1b_ref, wqkv_ref, wo_ref, bo_ref,
                              ln2g_ref, ln2b_ref, w1_ref, b1_ref, w2_ref, b2_ref,
                              out_ref, *, batch_tile, seq, heads, dim_head):
    layer = pl.program_id(1)
    bt, N, H, E = batch_tile, seq, heads, dim_head
    inner = H * E
    Mt = bt * N
    bf16 = jnp.bfloat16

    # Layer 0 of each batch slab seeds the residual stream from the input; later
    # layers read the activations carried (VMEM-resident) in out_ref.
    @pl.when(layer == 0)
    def _():
        out_ref[...] = x_ref[...]

    x = out_ref[...]                                              # (Mt, D) f32

    # ---------------- PreNorm + Attention ----------------
    xn = _layer_norm(x, ln1g_ref[...], ln1b_ref[...])             # f32

    # Single fused, lane-dense QKV projection. Column layout is the natural
    # PyTorch one: [Q_h0..Q_h{H-1} | K_h0.. | V_h0..]; the attention scale is
    # pre-folded into the Q columns in the wrapper.
    qkv = jnp.dot(xn.astype(bf16), wqkv_ref[...],
                  preferred_element_type=jnp.float32)             # (Mt, 3*inner) f32

    def heads_to_groups(base):
        # (Mt, inner) lane slab -> (H*bt, N, E), group index g = h*bt + b.
        # Static lane slices + layout-preserving reshapes only (no broadcast copies).
        return jnp.concatenate(
            [qkv[:, base + h * E: base + (h + 1) * E].reshape(bt, N, E)
             for h in range(H)], axis=0).astype(bf16)

    q_g = heads_to_groups(0)
    k_g = heads_to_groups(inner)
    v_g = heads_to_groups(2 * inner)

    # One batched score matmul and ONE softmax over all (head, batch) pairs.
    dots = jnp.einsum("gne,gme->gnm", q_g, k_g,
                      preferred_element_type=jnp.float32)         # (G, N, N) f32
    dots = dots - jnp.max(dots, axis=-1, keepdims=True)
    p = jnp.exp(dots)
    attn = p * pl.reciprocal(jnp.sum(p, axis=-1, keepdims=True), approx=True)

    o_g = jnp.einsum("gnm,gme->gne", attn.astype(bf16), v_g,
                     preferred_element_type=jnp.float32)          # (G, N, E) f32

    # Relayout (G, N, E) -> (Mt, inner) so the output projection is a single
    # matmul with K = inner (good MXU fill), not H small-K matmuls + reduce.
    o_cat = jnp.concatenate(
        [o_g[h * bt:(h + 1) * bt].reshape(Mt, E) for h in range(H)],
        axis=-1).astype(bf16)                                     # (Mt, inner)

    proj = jnp.dot(o_cat, wo_ref[...],
                   preferred_element_type=jnp.float32)            # (Mt, D)
    x = x + proj + bo_ref[...]                                    # residual 1

    # ---------------- PreNorm + FeedForward ----------------
    xn2 = _layer_norm(x, ln2g_ref[...], ln2b_ref[...])
    h1 = jnp.dot(xn2.astype(bf16), w1_ref[...],
                 preferred_element_type=jnp.float32) + b1_ref[...]
    h1 = jnp.maximum(h1, 0.0)
    ff = jnp.dot(h1.astype(bf16), w2_ref[...],
                 preferred_element_type=jnp.float32) + b2_ref[...]

    out_ref[...] = x + ff                                         # residual 2


def transformer_vanilla(x, layer_params, *, heads, dim_head, batch_tile=None):
    """Full Transformer_Vanilla forward: one fused pallas_call over all layers."""
    B, N, D = x.shape
    depth = len(layer_params)
    inner = heads * dim_head
    mlp_dim = layer_params[0]["w1"].shape[1]
    M = B * N

    # Batch-slab choice: a leading "parallel" grid axis over batch slabs lets the
    # two TensorCores of a v7x chip each take half the batch (neutral on 1-TC
    # chips) and bounds per-step attention temporaries; slabs must respect the
    # 8-row sublane tile.
    if batch_tile is None:
        if B % 2 == 0 and ((B // 2) * N) % 8 == 0:
            batch_tile = B // 2
        else:
            batch_tile = B
    assert B % batch_tile == 0
    M_t = batch_tile * N
    assert (M_t % 8 == 0) or (M_t == M), "batch_tile*seq must be a multiple of 8"

    scale = dim_head ** (-0.5)

    def stack(name):
        return jnp.stack([p[name] for p in layer_params], axis=0)

    # Weights stay in the natural (in, out) PyTorch column order; fold the
    # attention scale into the Q columns once (free vs. scaling every score tile).
    w_qkv = stack("w_qkv")
    w_qkv = w_qkv.at[:, :, :inner].multiply(scale).astype(jnp.bfloat16)   # (depth, D, 3*inner)
    w_out = stack("w_out").astype(jnp.bfloat16)                           # (depth, inner, D)
    w1 = stack("w1").astype(jnp.bfloat16)                                 # (depth, D, mlp)
    w2 = stack("w2").astype(jnp.bfloat16)                                 # (depth, mlp, D)

    ln1_g, ln1_b = stack("ln1_g"), stack("ln1_b")                         # (depth, 1, D) f32
    ln2_g, ln2_b = stack("ln2_g"), stack("ln2_b")
    b_out, b1, b2 = stack("b_out"), stack("b1"), stack("b2")

    kernel = functools.partial(_transformer_stack_kernel, batch_tile=batch_tile,
                               seq=N, heads=heads, dim_head=dim_head)

    # Residual stream: one (M_t, D) slab per batch tile, resident in VMEM across
    # the whole depth loop.
    # (At deployment sizes make D a multiple of 128 lanes so these stores are
    #  lane-dense; the toy D=32 layout is kept as-is to match LayerNorm semantics.)
    row = pl.BlockSpec((M_t, D), lambda bi, l: (bi, 0))

    def per_layer(*tail):
        zeros = (0,) * len(tail)
        return pl.BlockSpec((None,) + tuple(tail), lambda bi, l, _z=zeros: (l,) + _z)

    # VMEM budget (always set explicitly, per-chip): double-buffered per-layer
    # bf16 weights + in/out slabs + activation temporaries (qkv, the three
    # scores/softmax copies, grouped q/k/v, FFN hidden).
    G_t = heads * batch_tile
    wl_bytes = 2 * (D * 3 * inner + inner * D + D * mlp_dim + mlp_dim * D)   # bf16 weights / layer
    par_bytes = 4 * (6 * D + mlp_dim)                                        # f32 ln/bias / layer
    act_bytes = (4 * (5 * M_t * D + M_t * 3 * inner + 3 * G_t * N * N + 2 * M_t * mlp_dim)
                 + 2 * (2 * M_t * 3 * inner + M_t * inner + M_t * mlp_dim))
    est = 2 * (wl_bytes + par_bytes) + act_bytes + 4 * (4 * M_t * D)
    vmem_cap = 128 << 20
    try:
        vmem_cap = int(pltpu.get_tpu_info().vmem_capacity_bytes)   # 128 MiB v5e/v6e, 64 MiB v7x
    except Exception:
        pass
    vmem_limit = int(min(max(2 * est + (4 << 20), 32 << 20), (3 * vmem_cap) // 4))

    out2d = pl.pallas_call(
        kernel,
        out_shape=jax.ShapeDtypeStruct((M, D), x.dtype),
        grid=(B // batch_tile, depth),
        in_specs=[
            row,                                           # x (seeds the residual at layer 0)
            per_layer(1, D), per_layer(1, D),              # ln1 gamma / beta
            per_layer(D, 3 * inner),                       # W_qkv (bf16, Q pre-scaled)
            per_layer(inner, D),                           # W_out (bf16)
            per_layer(1, D),                               # b_out
            per_layer(1, D), per_layer(1, D),              # ln2 gamma / beta
            per_layer(D, mlp_dim), per_layer(1, mlp_dim),  # W1, b1
            per_layer(mlp_dim, D), per_layer(1, D),        # W2, b2
        ],
        out_specs=row,
        input_output_aliases={0: 0},                       # residual reuses x's HBM buffer
        compiler_params=pltpu.CompilerParams(
            dimension_semantics=("parallel", "arbitrary"),  # batch slabs parallel, layers sequential
            vmem_limit_bytes=vmem_limit,
        ),
    )(x.reshape(M, D), ln1_g, ln1_b, w_qkv, w_out, b_out,
      ln2_g, ln2_b, w1, b1, w2, b2)

    return out2d.reshape(B, N, D)


# ----------------------------------------------------------------------------
# Deterministic parameter init (weights stored (in, out); y = x @ W + b, i.e.
# PyTorch Linear's (out, in) weight transposed).
# ----------------------------------------------------------------------------
def init_params(key, depth, dim, heads, dim_head, mlp_dim):
    inner = heads * dim_head
    layers = []
    for _ in range(depth):
        key, k0, k1, k2, k3, k4, k5 = jax.random.split(key, 7)
        layers.append(dict(
            ln1_g=jnp.ones((1, dim), jnp.float32),
            ln1_b=jnp.zeros((1, dim), jnp.float32),
            w_qkv=jax.random.normal(k0, (dim, 3 * inner), jnp.float32) / jnp.sqrt(dim),
            w_out=jax.random.normal(k1, (inner, dim), jnp.float32) / jnp.sqrt(inner),
            b_out=jnp.zeros((1, dim), jnp.float32),
            ln2_g=jnp.ones((1, dim), jnp.float32),
            ln2_b=jnp.zeros((1, dim), jnp.float32),
            w1=jax.random.normal(k2, (dim, mlp_dim), jnp.float32) / jnp.sqrt(dim),
            b1=0.02 * jax.random.normal(k3, (1, mlp_dim), jnp.float32),
            w2=jax.random.normal(k4, (mlp_dim, dim), jnp.float32) / jnp.sqrt(mlp_dim),
            b2=0.02 * jax.random.normal(k5, (1, dim), jnp.float32),
        ))
    return layers


# ----------------------------------------------------------------------------
# Pure-JAX f32 reference (mirrors the PyTorch forward exactly).
# ----------------------------------------------------------------------------
def _reference(x, layer_params, *, heads, dim_head):
    eps = 1e-5
    inner = heads * dim_head
    scale = dim_head ** (-0.5)
    for p in layer_params:
        xn = (x - x.mean(-1, keepdims=True)) * jax.lax.rsqrt(x.var(-1, keepdims=True) + eps)
        xn = xn * p["ln1_g"][0] + p["ln1_b"][0]
        qkv = xn @ p["w_qkv"]
        q, k, v = jnp.split(qkv, 3, axis=-1)
        B, N, _ = q.shape
        q = q.reshape(B, N, heads, dim_head).transpose(0, 2, 1, 3)
        k = k.reshape(B, N, heads, dim_head).transpose(0, 2, 1, 3)
        v = v.reshape(B, N, heads, dim_head).transpose(0, 2, 1, 3)
        attn = jax.nn.softmax(jnp.einsum("bhnd,bhmd->bhnm", q, k) * scale, axis=-1)
        o = jnp.einsum("bhnm,bhmd->bhnd", attn, v).transpose(0, 2, 1, 3).reshape(B, N, inner)
        x = o @ p["w_out"] + p["b_out"][0] + x
        xn2 = (x - x.mean(-1, keepdims=True)) * jax.lax.rsqrt(x.var(-1, keepdims=True) + eps)
        xn2 = xn2 * p["ln2_g"][0] + p["ln2_b"][0]
        ff = jnp.maximum(xn2 @ p["w1"] + p["b1"][0], 0.0) @ p["w2"] + p["b2"][0]
        x = x + ff
    return x


if __name__ == "__main__":
    B, N, D = 2, 8, 32          # batch, num_patches (seq), dim
    heads, dim_head = 4, 8      # inner_dim = 32
    mlp_dim = 64
    depth = 2

    key = jax.random.PRNGKey(0)
    kx, kp = jax.random.split(key)
    x = jax.random.normal(kx, (B, N, D), jnp.float32)
    params = init_params(kp, depth, D, heads, dim_head, mlp_dim)

    # Jit the wrapper so the aliased (input_output_aliases) residual buffer is an
    # internal value XLA is free to reuse.
    fwd = jax.jit(functools.partial(transformer_vanilla, heads=heads, dim_head=dim_head))
    out = jax.block_until_ready(fwd(x, params))

    ref = _reference(x, params, heads=heads, dim_head=dim_head)
    assert out.shape == (B, N, D)
    # bf16 matmul operands (f32 accumulation) + approx reciprocal => loosened tolerance.
    err = float(jnp.max(jnp.abs(out - ref)))
    ref_scale = float(jnp.max(jnp.abs(ref)))
    assert err <= 5e-2 * ref_scale + 1e-3, f"mismatch: max|err|={err}, max|ref|={ref_scale}"

    print("KERNEL_OK")
</pallas_src>

<mosaic_0001>
module attributes {stable_mosaic.version = 11 : i64} {
  func.func @_transformer_stack_kernel(%arg0: i32, %arg1: i32, %arg2: memref<8x32xf32, #tpu.memory_space<vmem>>, %arg3: memref<1x1x32xf32, #tpu.memory_space<vmem>>, %arg4: memref<1x1x32xf32, #tpu.memory_space<vmem>>, %arg5: memref<1x32x96xbf16, #tpu.memory_space<vmem>>, %arg6: memref<1x32x32xbf16, #tpu.memory_space<vmem>>, %arg7: memref<1x1x32xf32, #tpu.memory_space<vmem>>, %arg8: memref<1x1x32xf32, #tpu.memory_space<vmem>>, %arg9: memref<1x1x32xf32, #tpu.memory_space<vmem>>, %arg10: memref<1x32x64xbf16, #tpu.memory_space<vmem>>, %arg11: memref<1x1x64xf32, #tpu.memory_space<vmem>>, %arg12: memref<1x64x32xbf16, #tpu.memory_space<vmem>>, %arg13: memref<1x1x32xf32, #tpu.memory_space<vmem>>, %arg14: memref<8x32xf32, #tpu.memory_space<vmem>>) attributes {dimension_semantics = [#tpu.dimension_semantics<parallel>, #tpu.dimension_semantics<arbitrary>], iteration_bounds = array<i64: 2, 2>, scalar_prefetch = 0 : i64, scratch_operands = 0 : i64, tpu.core_type = #tpu.core_type<tc>, window_params = [{transform_indices = @transform_0, window_bounds = array<i64: 8, 32>}, {transform_indices = @transform_1, window_bounds = array<i64: 1, 1, 32>}, {transform_indices = @transform_2, window_bounds = array<i64: 1, 1, 32>}, {transform_indices = @transform_3, window_bounds = array<i64: 1, 32, 96>}, {transform_indices = @transform_4, window_bounds = array<i64: 1, 32, 32>}, {transform_indices = @transform_5, window_bounds = array<i64: 1, 1, 32>}, {transform_indices = @transform_6, window_bounds = array<i64: 1, 1, 32>}, {transform_indices = @transform_7, window_bounds = array<i64: 1, 1, 32>}, {transform_indices = @transform_8, window_bounds = array<i64: 1, 32, 64>}, {transform_indices = @transform_9, window_bounds = array<i64: 1, 1, 64>}, {transform_indices = @transform_10, window_bounds = array<i64: 1, 64, 32>}, {transform_indices = @transform_11, window_bounds = array<i64: 1, 1, 32>}, {transform_indices = @transform_12, window_bounds = array<i64: 8, 32>}]} {
    %c0_i32 = arith.constant 0 : i32
    %0 = arith.cmpi eq, %arg1, %c0_i32 : i32
    %1 = arith.extui %0 : i1 to i32
    %c0_i32_0 = arith.constant 0 : i32
    %2 = arith.cmpi ne, %1, %c0_i32_0 : i32
    scf.if %2 {
      %c0_55 = arith.constant 0 : index
      %c0_56 = arith.constant 0 : index
      %141 = vector.load %arg2[%c0_55, %c0_56] : memref<8x32xf32, #tpu.memory_space<vmem>>, vector<8x32xf32>
      %c0_57 = arith.constant 0 : index
      %c0_58 = arith.constant 0 : index
      %142 = vector.load %arg14[%c0_57, %c0_58] : memref<8x32xf32, #tpu.memory_space<vmem>>, vector<8x32xf32>
      tpu.vector_store %arg14[%c0_57, %c0_58], %141 {strides = array<i32>} : memref<8x32xf32, #tpu.memory_space<vmem>>, vector<8x32xf32>,
    } else {
    }
    %c0 = arith.constant 0 : index
    %c0_1 = arith.constant 0 : index
    %3 = vector.load %arg14[%c0, %c0_1] : memref<8x32xf32, #tpu.memory_space<vmem>>, vector<8x32xf32>
    %c0_2 = arith.constant 0 : index
    %c0_3 = arith.constant 0 : index
    %c0_4 = arith.constant 0 : index
    %4 = vector.load %arg3[%c0_2, %c0_3, %c0_4] : memref<1x1x32xf32, #tpu.memory_space<vmem>>, vector<1x1x32xf32>
    %5 = vector.shape_cast %4 : vector<1x1x32xf32> to vector<1x32xf32>
    %c0_5 = arith.constant 0 : index
    %c0_6 = arith.constant 0 : index
    %c0_7 = arith.constant 0 : index
    %6 = vector.load %arg4[%c0_5, %c0_6, %c0_7] : memref<1x1x32xf32, #tpu.memory_space<vmem>>, vector<1x1x32xf32>
    %7 = vector.shape_cast %6 : vector<1x1x32xf32> to vector<1x32xf32>
    %cst = arith.constant dense<0.000000e+00> : vector<8xf32>
    %8 = vector.multi_reduction <add>, %3, %cst [1] : vector<8x32xf32> to vector<8xf32>
    %9 = vector.shape_cast %8 : vector<8xf32> to vector<8x1xf32>
    %cst_8 = arith.constant 3.200000e+01 : f32
    %10 = vector.broadcast %cst_8 : f32 to vector<8x1xf32>
    %11 = arith.divf %9, %10 : vector<8x1xf32>
    %12 = vector.broadcast %11 : vector<8x1xf32> to vector<8x32xf32>
    %13 = arith.subf %3, %12 : vector<8x32xf32>
    %14 = arith.mulf %13, %13 : vector<8x32xf32>
    %cst_9 = arith.constant dense<0.000000e+00> : vector<8xf32>
    %15 = vector.multi_reduction <add>, %14, %cst_9 [1] : vector<8x32xf32> to vector<8xf32>
    %16 = vector.shape_cast %15 : vector<8xf32> to vector<8x1xf32>
    %cst_10 = arith.constant 3.200000e+01 : f32
    %17 = vector.broadcast %cst_10 : f32 to vector<8x1xf32>
    %18 = arith.divf %16, %17 : vector<8x1xf32>
    %19 = vector.broadcast %11 : vector<8x1xf32> to vector<8x32xf32>
    %20 = arith.subf %3, %19 : vector<8x32xf32>
    %cst_11 = arith.constant 9.99999974E-6 : f32
    %21 = vector.broadcast %cst_11 : f32 to vector<8x1xf32>
    %22 = arith.addf %18, %21 : vector<8x1xf32>
    %23 = math.rsqrt %22 : vector<8x1xf32>
    %24 = vector.broadcast %23 : vector<8x1xf32> to vector<8x32xf32>
    %25 = arith.mulf %20, %24 : vector<8x32xf32>
    %26 = vector.broadcast %5 : vector<1x32xf32> to vector<8x32xf32>
    %27 = arith.mulf %25, %26 : vector<8x32xf32>
    %28 = vector.broadcast %7 : vector<1x32xf32> to vector<8x32xf32>
    %29 = arith.addf %27, %28 : vector<8x32xf32>
    %30 = arith.truncf %29 : vector<8x32xf32> to vector<8x32xbf16>
    %c0_12 = arith.constant 0 : index
    %c0_13 = arith.constant 0 : index
    %c0_14 = arith.constant 0 : index
    %31 = vector.load %arg5[%c0_12, %c0_13, %c0_14] : memref<1x32x96xbf16, #tpu.memory_space<vmem>>, vector<1x32x96xbf16>
    %32 = vector.shape_cast %31 : vector<1x32x96xbf16> to vector<32x96xbf16>
    %cst_15 = arith.constant dense<0.000000e+00> : vector<8x96xf32>
    %33 = tpu.matmul %30, %32, %cst_15 {dimension_numbers = #tpu.dot_dimension_numbers<[1], [0], [0], [1], [0, 0, 1, 1], [], []>} : vector<8x32xbf16>, vector<32x96xbf16>, vector<8x96xf32> -> vector<8x96xf32>
    %34 = vector.extract_strided_slice %33 {offsets = [0, 0], sizes = [8, 8], strides = [1, 1]} : vector<8x96xf32> to vector<8x8xf32>
    %35 = vector.shape_cast %34 : vector<8x8xf32> to vector<1x8x8xf32>
    %36 = vector.extract_strided_slice %33 {offsets = [0, 8], sizes = [8, 8], strides = [1, 1]} : vector<8x96xf32> to vector<8x8xf32>
    %37 = vector.shape_cast %36 : vector<8x8xf32> to vector<1x8x8xf32>
    %38 = vector.extract_strided_slice %33 {offsets = [0, 16], sizes = [8, 8], strides = [1, 1]} : vector<8x96xf32> to vector<8x8xf32>
    %39 = vector.shape_cast %38 : vector<8x8xf32> to vector<1x8x8xf32>
    %40 = vector.extract_strided_slice %33 {offsets = [0, 24], sizes = [8, 8], strides = [1, 1]} : vector<8x96xf32> to vector<8x8xf32>
    %41 = vector.shape_cast %40 : vector<8x8xf32> to vector<1x8x8xf32>
    %42 = tpu.concatenate %35, %37, %39, %41 in 0 : vector<1x8x8xf32>, vector<1x8x8xf32>, vector<1x8x8xf32>, vector<1x8x8xf32> -> vector<4x8x8xf32>
    %43 = arith.truncf %42 : vector<4x8x8xf32> to vector<4x8x8xbf16>
    %44 = vector.extract_strided_slice %33 {offsets = [0, 32], sizes = [8, 8], strides = [1, 1]} : vector<8x96xf32> to vector<8x8xf32>
    %45 = vector.shape_cast %44 : vector<8x8xf32> to vector<1x8x8xf32>
    %46 = vector.extract_strided_slice %33 {offsets = [0, 40], sizes = [8, 8], strides = [1, 1]} : vector<8x96xf32> to vector<8x8xf32>
    %47 = vector.shape_cast %46 : vector<8x8xf32> to vector<1x8x8xf32>
    %48 = vector.extract_strided_slice %33 {offsets = [0, 48], sizes = [8, 8], strides = [1, 1]} : vector<8x96xf32> to vector<8x8xf32>
    %49 = vector.shape_cast %48 : vector<8x8xf32> to vector<1x8x8xf32>
    %50 = vector.extract_strided_slice %33 {offsets = [0, 56], sizes = [8, 8], strides = [1, 1]} : vector<8x96xf32> to vector<8x8xf32>
    %51 = vector.shape_cast %50 : vector<8x8xf32> to vector<1x8x8xf32>
    %52 = tpu.concatenate %45, %47, %49, %51 in 0 : vector<1x8x8xf32>, vector<1x8x8xf32>, vector<1x8x8xf32>, vector<1x8x8xf32> -> vector<4x8x8xf32>
    %53 = arith.truncf %52 : vector<4x8x8xf32> to vector<4x8x8xbf16>
    %54 = vector.extract_strided_slice %33 {offsets = [0, 64], sizes = [8, 8], strides = [1, 1]} : vector<8x96xf32> to vector<8x8xf32>
    %55 = vector.shape_cast %54 : vector<8x8xf32> to vector<1x8x8xf32>
    %56 = vector.extract_strided_slice %33 {offsets = [0, 72], sizes = [8, 8], strides = [1, 1]} : vector<8x96xf32> to vector<8x8xf32>
    %57 = vector.shape_cast %56 : vector<8x8xf32> to vector<1x8x8xf32>
    %58 = vector.extract_strided_slice %33 {offsets = [0, 80], sizes = [8, 8], strides = [1, 1]} : vector<8x96xf32> to vector<8x8xf32>
    %59 = vector.shape_cast %58 : vector<8x8xf32> to vector<1x8x8xf32>
    %60 = vector.extract_strided_slice %33 {offsets = [0, 88], sizes = [8, 8], strides = [1, 1]} : vector<8x96xf32> to vector<8x8xf32>
    %61 = vector.shape_cast %60 : vector<8x8xf32> to vector<1x8x8xf32>
    %62 = tpu.concatenate %55, %57, %59, %61 in 0 : vector<1x8x8xf32>, vector<1x8x8xf32>, vector<1x8x8xf32>, vector<1x8x8xf32> -> vector<4x8x8xf32>
    %63 = arith.truncf %62 : vector<4x8x8xf32> to vector<4x8x8xbf16>
    "tpu.trace_start"() <{level = 10 : i32, message = "gne,gme->gnm"}> : () -> ()
    %cst_16 = arith.constant dense<0.000000e+00> : vector<4x8x8xf32>
    %64 = tpu.matmul %43, %53, %cst_16 {dimension_numbers = #tpu.dot_dimension_numbers<[2], [2], [1], [1], [0, 0, 0, 1, 1, 1], [0], [0]>} : vector<4x8x8xbf16>, vector<4x8x8xbf16>, vector<4x8x8xf32> -> vector<4x8x8xf32>
    "tpu.trace_stop"() : () -> ()
    %cst_17 = arith.constant dense<0xFF800000> : vector<4x8xf32>
    %65 = vector.multi_reduction <maximumf>, %64, %cst_17 [2] : vector<4x8x8xf32> to vector<4x8xf32>
    %66 = vector.shape_cast %65 : vector<4x8xf32> to vector<4x8x1xf32>
    %67 = vector.broadcast %66 : vector<4x8x1xf32> to vector<4x8x8xf32>
    %68 = arith.subf %64, %67 : vector<4x8x8xf32>
    %69 = math.exp %68 : vector<4x8x8xf32>
    %cst_18 = arith.constant dense<0.000000e+00> : vector<4x8xf32>
    %70 = vector.multi_reduction <add>, %69, %cst_18 [2] : vector<4x8x8xf32> to vector<4x8xf32>
    %71 = vector.shape_cast %70 : vector<4x8xf32> to vector<4x8x1xf32>
    %72 = tpu.reciprocal %71 {approx = true} : vector<4x8x1xf32> -> vector<4x8x1xf32>
    %73 = vector.broadcast %72 : vector<4x8x1xf32> to vector<4x8x8xf32>
    %74 = arith.mulf %69, %73 : vector<4x8x8xf32>
    %75 = arith.truncf %74 : vector<4x8x8xf32> to vector<4x8x8xbf16>
    "tpu.trace_start"() <{level = 10 : i32, message = "gnm,gme->gne"}> : () -> ()
    %cst_19 = arith.constant dense<0.000000e+00> : vector<4x8x8xf32>
    %76 = tpu.matmul %75, %63, %cst_19 {dimension_numbers = #tpu.dot_dimension_numbers<[2], [1], [1], [2], [0, 0, 0, 1, 1, 2], [0], [0]>} : vector<4x8x8xbf16>, vector<4x8x8xbf16>, vector<4x8x8xf32> -> vector<4x8x8xf32>
    "tpu.trace_stop"() : () -> ()
    %77 = vector.extract_strided_slice %76 {offsets = [0, 0, 0], sizes = [1, 8, 8], strides = [1, 1, 1]} : vector<4x8x8xf32> to vector<1x8x8xf32>
    %78 = vector.shape_cast %77 : vector<1x8x8xf32> to vector<8x8xf32>
    %79 = vector.extract_strided_slice %76 {offsets = [1, 0, 0], sizes = [1, 8, 8], strides = [1, 1, 1]} : vector<4x8x8xf32> to vector<1x8x8xf32>
    %80 = vector.shape_cast %79 : vector<1x8x8xf32> to vector<8x8xf32>
    %81 = vector.extract_strided_slice %76 {offsets = [2, 0, 0], sizes = [1, 8, 8], strides = [1, 1, 1]} : vector<4x8x8xf32> to vector<1x8x8xf32>
    %82 = vector.shape_cast %81 : vector<1x8x8xf32> to vector<8x8xf32>
    %83 = vector.extract_strided_slice %76 {offsets = [3, 0, 0], sizes = [1, 8, 8], strides = [1, 1, 1]} : vector<4x8x8xf32> to vector<1x8x8xf32>
    %84 = vector.shape_cast %83 : vector<1x8x8xf32> to vector<8x8xf32>
    %85 = tpu.concatenate %78, %80, %82, %84 in 1 : vector<8x8xf32>, vector<8x8xf32>, vector<8x8xf32>, vector<8x8xf32> -> vector<8x32xf32>
    %86 = arith.truncf %85 : vector<8x32xf32> to vector<8x32xbf16>
    %c0_20 = arith.constant 0 : index
    %c0_21 = arith.constant 0 : index
    %c0_22 = arith.constant 0 : index
    %87 = vector.load %arg6[%c0_20, %c0_21, %c0_22] : memref<1x32x32xbf16, #tpu.memory_space<vmem>>, vector<1x32x32xbf16>
    %88 = vector.shape_cast %87 : vector<1x32x32xbf16> to vector<32x32xbf16>
    %cst_23 = arith.constant dense<0.000000e+00> : vector<8x32xf32>
    %89 = tpu.matmul %86, %88, %cst_23 {dimension_numbers = #tpu.dot_dimension_numbers<[1], [0], [0], [1], [0, 0, 1, 1], [], []>} : vector<8x32xbf16>, vector<32x32xbf16>, vector<8x32xf32> -> vector<8x32xf32>
    %90 = arith.addf %3, %89 : vector<8x32xf32>
    %c0_24 = arith.constant 0 : index
    %c0_25 = arith.constant 0 : index
    %c0_26 = arith.constant 0 : index
    %91 = vector.load %arg7[%c0_24, %c0_25, %c0_26] : memref<1x1x32xf32, #tpu.memory_space<vmem>>, vector<1x1x32xf32>
    %92 = vector.shape_cast %91 : vector<1x1x32xf32> to vector<1x32xf32>
    %93 = vector.broadcast %92 : vector<1x32xf32> to vector<8x32xf32>
    %94 = arith.addf %90, %93 : vector<8x32xf32>
    %c0_27 = arith.constant 0 : index
    %c0_28 = arith.constant 0 : index
    %c0_29 = arith.constant 0 : index
    %95 = vector.load %arg8[%c0_27, %c0_28, %c0_29] : memref<1x1x32xf32, #tpu.memory_space<vmem>>, vector<1x1x32xf32>
    %96 = vector.shape_cast %95 : vector<1x1x32xf32> to vector<1x32xf32>
    %c0_30 = arith.constant 0 : index
    %c0_31 = arith.constant 0 : index
    %c0_32 = arith.constant 0 : index
    %97 = vector.load %arg9[%c0_30, %c0_31, %c0_32] : memref<1x1x32xf32, #tpu.memory_space<vmem>>, vector<1x1x32xf32>
    %98 = vector.shape_cast %97 : vector<1x1x32xf32> to vector<1x32xf32>
    %cst_33 = arith.constant dense<0.000000e+00> : vector<8xf32>
    %99 = vector.multi_reduction <add>, %94, %cst_33 [1] : vector<8x32xf32> to vector<8xf32>
    %100 = vector.shape_cast %99 : vector<8xf32> to vector<8x1xf32>
    %cst_34 = arith.constant 3.200000e+01 : f32
    %101 = vector.broadcast %cst_34 : f32 to vector<8x1xf32>
    %102 = arith.divf %100, %101 : vector<8x1xf32>
    %103 = vector.broadcast %102 : vector<8x1xf32> to vector<8x32xf32>
    %104 = arith.subf %94, %103 : vector<8x32xf32>
    %105 = arith.mulf %104, %104 : vector<8x32xf32>
    %cst_35 = arith.constant dense<0.000000e+00> : vector<8xf32>
    %106 = vector.multi_reduction <add>, %105, %cst_35 [1] : vector<8x32xf32> to vector<8xf32>
    %107 = vector.shape_cast %106 : vector<8xf32> to vector<8x1xf32>
    %cst_36 = arith.constant 3.200000e+01 : f32
    %108 = vector.broadcast %cst_36 : f32 to vector<8x1xf32>
    %109 = arith.divf %107, %108 : vector<8x1xf32>
    %110 = vector.broadcast %102 : vector<8x1xf32> to vector<8x32xf32>
    %111 = arith.subf %94, %110 : vector<8x32xf32>
    %cst_37 = arith.constant 9.99999974E-6 : f32
    %112 = vector.broadcast %cst_37 : f32 to vector<8x1xf32>
    %113 = arith.addf %109, %112 : vector<8x1xf32>
    %114 = math.rsqrt %113 : vector<8x1xf32>
    %115 = vector.broadcast %114 : vector<8x1xf32> to vector<8x32xf32>
    %116 = arith.mulf %111, %115 : vector<8x32xf32>
    %117 = vector.broadcast %96 : vector<1x32xf32> to vector<8x32xf32>
    %118 = arith.mulf %116, %117 : vector<8x32xf32>
    %119 = vector.broadcast %98 : vector<1x32xf32> to vector<8x32xf32>
    %120 = arith.addf %118, %119 : vector<8x32xf32>
    %121 = arith.truncf %120 : vector<8x32xf32> to vector<8x32xbf16>
    %c0_38 = arith.constant 0 : index
    %c0_39 = arith.constant 0 : index
    %c0_40 = arith.constant 0 : index
    %122 = vector.load %arg10[%c0_38, %c0_39, %c0_40] : memref<1x32x64xbf16, #tpu.memory_space<vmem>>, vector<1x32x64xbf16>
    %123 = vector.shape_cast %122 : vector<1x32x64xbf16> to vector<32x64xbf16>
    %cst_41 = arith.constant dense<0.000000e+00> : vector<8x64xf32>
    %124 = tpu.matmul %121, %123, %cst_41 {dimension_numbers = #tpu.dot_dimension_numbers<[1], [0], [0], [1], [0, 0, 1, 1], [], []>} : vector<8x32xbf16>, vector<32x64xbf16>, vector<8x64xf32> -> vector<8x64xf32>
    %c0_42 = arith.constant 0 : index
    %c0_43 = arith.constant 0 : index
    %c0_44 = arith.constant 0 : index
    %125 = vector.load %arg11[%c0_42, %c0_43, %c0_44] : memref<1x1x64xf32, #tpu.memory_space<vmem>>, vector<1x1x64xf32>
    %126 = vector.shape_cast %125 : vector<1x1x64xf32> to vector<1x64xf32>
    %127 = vector.broadcast %126 : vector<1x64xf32> to vector<8x64xf32>
    %128 = arith.addf %124, %127 : vector<8x64xf32>
    %cst_45 = arith.constant 0.000000e+00 : f32
    %129 = vector.broadcast %cst_45 : f32 to vector<8x64xf32>
    %130 = arith.maximumf %128, %129 : vector<8x64xf32>
    %131 = arith.truncf %130 : vector<8x64xf32> to vector<8x64xbf16>
    %c0_46 = arith.constant 0 : index
    %c0_47 = arith.constant 0 : index
    %c0_48 = arith.constant 0 : index
    %132 = vector.load %arg12[%c0_46, %c0_47, %c0_48] : memref<1x64x32xbf16, #tpu.memory_space<vmem>>, vector<1x64x32xbf16>
    %133 = vector.shape_cast %132 : vector<1x64x32xbf16> to vector<64x32xbf16>
    %cst_49 = arith.constant dense<0.000000e+00> : vector<8x32xf32>
    %134 = tpu.matmul %131, %133, %cst_49 {dimension_numbers = #tpu.dot_dimension_numbers<[1], [0], [0], [1], [0, 0, 1, 1], [], []>} : vector<8x64xbf16>, vector<64x32xbf16>, vector<8x32xf32> -> vector<8x32xf32>
    %c0_50 = arith.constant 0 : index
    %c0_51 = arith.constant 0 : index
    %c0_52 = arith.constant 0 : index
    %135 = vector.load %arg13[%c0_50, %c0_51, %c0_52] : memref<1x1x32xf32, #tpu.memory_space<vmem>>, vector<1x1x32xf32>
    %136 = vector.shape_cast %135 : vector<1x1x32xf32> to vector<1x32xf32>
    %137 = vector.broadcast %136 : vector<1x32xf32> to vector<8x32xf32>
    %138 = arith.addf %134, %137 : vector<8x32xf32>
    %139 = arith.addf %94, %138 : vector<8x32xf32>
    %c0_53 = arith.constant 0 : index
    %c0_54 = arith.constant 0 : index
    %140 = vector.load %arg14[%c0_53, %c0_54] : memref<8x32xf32, #tpu.memory_space<vmem>>, vector<8x32xf32>
    tpu.vector_store %arg14[%c0_53, %c0_54], %139 {strides = array<i32>} : memref<8x32xf32, #tpu.memory_space<vmem>>, vector<8x32xf32>,
    return
  }
  func.func @transform_0(%arg0: i32, %arg1: i32) -> (i32, i32) {
    %c0_i32 = arith.constant 0 : i32
    %c0_i32_0 = arith.constant 0 : i32
    return %arg0, %c0_i32 : i32, i32
  }
  func.func @transform_1(%arg0: i32, %arg1: i32) -> (i32, i32, i32) {
    %c0_i32 = arith.constant 0 : i32
    %c0_i32_0 = arith.constant 0 : i32
    %c0_i32_1 = arith.constant 0 : i32
    return %arg1, %c0_i32, %c0_i32_0 : i32, i32, i32
  }
  func.func @transform_2(%arg0: i32, %arg1: i32) -> (i32, i32, i32) {
    %c0_i32 = arith.constant 0 : i32
    %c0_i32_0 = arith.constant 0 : i32
    %c0_i32_1 = arith.constant 0 : i32
    return %arg1, %c0_i32, %c0_i32_0 : i32, i32, i32
  }
  func.func @transform_3(%arg0: i32, %arg1: i32) -> (i32, i32, i32) {
    %c0_i32 = arith.constant 0 : i32
    %c0_i32_0 = arith.constant 0 : i32
    %c0_i32_1 = arith.constant 0 : i32
    return %arg1, %c0_i32, %c0_i32_0 : i32, i32, i32
  }
  func.func @transform_4(%arg0: i32, %arg1: i32) -> (i32, i32, i32) {
    %c0_i32 = arith.constant 0 : i32
    %c0_i32_0 = arith.constant 0 : i32
    %c0_i32_1 = arith.constant 0 : i32
    return %arg1, %c0_i32, %c0_i32_0 : i32, i32, i32
  }
  func.func @transform_5(%arg0: i32, %arg1: i32) -> (i32, i32, i32) {
    %c0_i32 = arith.constant 0 : i32
    %c0_i32_0 = arith.constant 0 : i32
    %c0_i32_1 = arith.constant 0 : i32
    return %arg1, %c0_i32, %c0_i32_0 : i32, i32, i32
  }
  func.func @transform_6(%arg0: i32, %arg1: i32) -> (i32, i32, i32) {
    %c0_i32 = arith.constant 0 : i32
    %c0_i32_0 = arith.constant 0 : i32
    %c0_i32_1 = arith.constant 0 : i32
    return %arg1, %c0_i32, %c0_i32_0 : i32, i32, i32
  }
  func.func @transform_7(%arg0: i32, %arg1: i32) -> (i32, i32, i32) {
    %c0_i32 = arith.constant 0 : i32
    %c0_i32_0 = arith.constant 0 : i32
    %c0_i32_1 = arith.constant 0 : i32
    return %arg1, %c0_i32, %c0_i32_0 : i32, i32, i32
  }
  func.func @transform_8(%arg0: i32, %arg1: i32) -> (i32, i32, i32) {
    %c0_i32 = arith.constant 0 : i32
    %c0_i32_0 = arith.constant 0 : i32
    %c0_i32_1 = arith.constant 0 : i32
    return %arg1, %c0_i32, %c0_i32_0 : i32, i32, i32
  }
  func.func @transform_9(%arg0: i32, %arg1: i32) -> (i32, i32, i32) {
    %c0_i32 = arith.constant 0 : i32
    %c0_i32_0 = arith.constant 0 : i32
    %c0_i32_1 = arith.constant 0 : i32
    return %arg1, %c0_i32, %c0_i32_0 : i32, i32, i32
  }
  func.func @transform_10(%arg0: i32, %arg1: i32) -> (i32, i32, i32) {
    %c0_i32 = arith.constant 0 : i32
    %c0_i32_0 = arith.constant 0 : i32
    %c0_i32_1 = arith.constant 0 : i32
    return %arg1, %c0_i32, %c0_i32_0 : i32, i32, i32
  }
  func.func @transform_11(%arg0: i32, %arg1: i32) -> (i32, i32, i32) {
    %c0_i32 = arith.constant 0 : i32
    %c0_i32_0 = arith.constant 0 : i32
    %c0_i32_1 = arith.constant 0 : i32
    return %arg1, %c0_i32, %c0_i32_0 : i32, i32, i32
  }
  func.func @transform_12(%arg0: i32, %arg1: i32) -> (i32, i32) {
    %c0_i32 = arith.constant 0 : i32
    %c0_i32_0 = arith.constant 0 : i32
    return %arg0, %c0_i32 : i32, i32
  }
}

</mosaic_0001>

<bundles_post_ra>
// kernel: transformer_vanilla.1
= control target key start
LH: loop header
LB: loop body
LE: loop exit
PB: predicated region body
PF: predicated region fallthrough
CT: control target
= control target key end

     0   :  { %s1558_s21 = smov 0   ;;  %s1560_s22 = smov 0   ;;  %s1776_s0 = inlined_call_operand.vmem [shape: f32[16,32], index: 0, kind: input, shape index: {}, may-alias: {0,12}]   ;;  %s1777_s1 = inlined_call_operand.vmem [shape: f32[2,1,32], index: 1, kind: input, shape index: {}]   ;;  %s1778_s2 = inlined_call_operand.vmem [shape: f32[2,1,32], index: 2, kind: input, shape index: {}]   ;;  %s1779_s3 = inlined_call_operand.vmem [shape: bf16[2,32,96], index: 3, kind: input, shape index: {}]   ;;  %s1780_s4 = inlined_call_operand.vmem [shape: bf16[2,32,32], index: 4, kind: input, shape index: {}]   ;;  %s1781_s5 = inlined_call_operand.vmem [shape: f32[2,1,32], index: 5, kind: input, shape index: {}]   ;;  %s1782_s6 = inlined_call_operand.vmem [shape: f32[2,1,32], index: 6, kind: input, shape index: {}]   ;;  %s1783_s7 = inlined_call_operand.vmem [shape: f32[2,1,32], index: 7, kind: input, shape index: {}]   ;;  %s1784_s8 = inlined_call_operand.vmem [shape: bf16[2,32,64], index: 8, kind: input, shape index: {}]   ;;  %s1785_s9 = inlined_call_operand.vmem [shape: f32[2,1,64], index: 9, kind: input, shape index: {}]   ;;  %s1786_s10 = inlined_call_operand.vmem [shape: bf16[2,64,32], index: 10, kind: input, shape index: {}]   ;;  %s1787_s11 = inlined_call_operand.vmem [shape: f32[2,1,32], index: 11, kind: input, shape index: {}]   ;;  %s1788_s12 = inlined_call_operand.vmem [shape: f32[16,32], index: 12, kind: output, shape index: {}, may-alias: {0,12}]  }
   0x1   :  { %1794 = sst [smem:[#allocation9_spill]] %s1776_s0  ;;  %s1562_s23 = smov 0  }
   0x2   :  { %1795 = sst [smem:[#allocation10_spill]] %s1779_s3  ;;  %s1564_s24 = smov 0  }
   0x3   :  { %1796 = sst [smem:[#allocation11_spill]] %s1780_s4  ;;  %s1566_s25 = smov 0  }
   0x4 LB: > { %1797 = sst [smem:[#allocation2_spill]] %s1466_s21  ;;  %s31_s26 = sadd.s32 1, %s1474_s23  ;;  %s1482_s25 = sphi %s1566_s25, %s22_s25   ;;  %s1478_s24 = sphi %s1564_s24, %s1817_s24   ;;  %s1474_s23 = sphi %s1562_s23, %s1816_s23   ;;  %s1470_s22 = sphi %s1560_s22, %s1815_s22   ;;  %s1466_s21 = sphi %s1558_s21, %s1814_s21  }
   0x5   : > { %1798 = sst [smem:[#allocation3_spill]] %s1474_s23  ;;  %s34_s27 = sadd.s32 1, %s1478_s24 }
   0x6   : > { %1799 = sst [smem:[#allocation4_spill]] %s1478_s24  ;;  %p32_p0 = scmp.ge.s32.totalorder %s31_s26, 2 }
   0x7   : > { %1800 = sst [smem:[#allocation5_spill]] %s1482_s25  ;;  %p1286_p1 = scmp.ge.s32.totalorder %s1482_s25, 1 }
   0x8   : > { %p469_p2 = scmp.lt.s32.totalorder %s1482_s25, 5  ;;  %s1819_s26 = smov (%p32_p0, %s31_s26), 0 }
   0x9   : > { %1801 = sst [smem:[#allocation6_spill]] %s1819_s26  ;;  %s1821_s27 = smov (!%p32_p0, %s34_s27), %s1478_s24 }
   0xa   : > { %p470_p3 = pnand %p1286_p1, %p469_p2  ;;  %p36_p4 = scmp.ge.s32.totalorder %s1821_s27, 2 }
   0xc   : > { %s1823_s27 = smov (%p36_p4, %s1821_s27), 0  ;;  %473 = sbr.rel (%p470_p3) target bundleno = 1996 (0x7cc), region = 68 }
   0xd   : > { %1802 = sst [smem:[#allocation7_spill]] %s1823_s27 }
  0x11   : > { %p550_p5 = scmp.lt.s32.totalorder %s1470_s22, 1  ;;  %p554_p6 = scmp.lt.s32.totalorder %s1466_s21, 1 }
  0x12   : > { %s1803_s0 = sld [smem:[#allocation9_spill]] }
  0x13   : > { %s1825_s22 = smov (!%p550_p5, %s1470_s22), 1  ;;  %s1804_s3 = sld [smem:[#allocation10_spill]] }
  0x14   : > { %s1592_s28 = scalar_select %p554_p6, %s1466_s21, 1 }
  0x15   : > { %s1287_s29 = sshll.u32 %s1825_s22, 3  ;;  %s1805_s4 = sld [smem:[#allocation11_spill]] }
  0x16   : > { %s1352_s27 = sshll.u32 %s1592_s28, 4  ;;  %s575_s18 = scalar_lea.vmem %s1782_s6, %s1592_s28 }
  0x17   : > { %s594_s20 = scalar_lea.vmem %s1787_s11, %s1592_s28  ;;  %s1650_s24 = scalar_lea.vmem %s1788_s12, %s1287_s29 }
  0x18   : > { %s553_s14 = scalar_lea.vmem %s1803_s0, %s1287_s29 }
  0x19   : > { %s1609_s23 = scalar_lea.vmem %s1804_s3, %s1352_s27  ;;  %s1631_s3 = scalar_lea.vmem %s1784_s8, %s1352_s27 }
  0x1b   : > { %s1614_s21 = scalar_lea.vmem %s1805_s4, %s1352_s27  ;;  %s586_s4 = scalar_lea.vmem %s1785_s9, %s1592_s28 }
  0x1c   : > { %1806 = sst [smem:[#allocation8_spill]] %s1614_s21  ;;  %s1355_s21 = sshll.u32 %s1592_s28, 5 }
  0x1d   : > { %s1641_s15 = scalar_lea.vmem %s1786_s10, %s1355_s21  ;;  %s1807_s27 = sld [smem:[#allocation2_spill]] }
  0x23   : > { %p1297_p7 = scmp.ne.s32.totalorder %s1807_s27, 0 }
  0x25   : > { %603 = sbr.rel (%p1297_p7) target bundleno = 44 (0x2c), region = 72 }
  0x2a   : > { %v604_v0 = vld [vmem:[%s553_s14] sm:$0xff]  ;;  %vm605_vm0 = vcmask 261120  }
  0x2b   : > { %606 = vst.msk [vmem:[%s1650_s24] sm:$0xff] %vm605_vm0, %v604_v0 }
  0x2c PF: > { %vm610_vm1 = vcmask 261120   ;;  %v1484_v3 = vmov 32.0   ;;  %v1357_v15 = vld [vmem:[%s1609_s23 + $0x8] sm:$0xff]  ;;  %v1356_v16 = vld [vmem:[%s1609_s23] sm:$0xff]  ;;  %s1808_s23 = scalar_lea.vmem %s1777_s1, %s1592_s28  ;;  %s1809_s26 = scalar_lea.vmem %s1778_s2, %s1592_s28  ;;  %vm700_vm6 = vcmask 64512   ;;  %vm845_vm7 = vcmask 1043456  }
  0x2d   : > { %1422 = vrcp.f32 %v1484_v3  ;;  %674 = vmatpush.bf16.msra.mxu0 %v1357_v15  ;;  %v1415_v26 = vld [vmem:[%s1808_s23] ss:$0 sm:$0xff]  ;;  %s1485_s25 = smov 104   ;;  %s1486_s22 = smov 120   ;;  %vm938_vm8 = vcmask 130048   ;;  %vm940_vm9 = vcmask 195584  }
  0x2e   : > { %v1416_v29 = vld [vmem:[%s1809_s26] ss:$0 sm:$0xff]  ;;  %s1487_s30 = smov 112   ;;  %s1488_s13 = smov 96   ;;  %vm1088_vm13 = vcmask 523264  }
  0x2f   : > { %s1489_s17 = smov 64   ;;  %s1810_s16 = sld [smem:[#allocation8_spill]] }
  0x30   : > { %s1490_s19 = smov 8   ;;  %s1491_s27 = smov 24  }
  0x31   : > { %675 = vmatpush.bf16.msra.mxu0 %v1356_v16  ;;  %s1492_s0 = smov 16   ;;  %s1811_s29 = scalar_lea.vmem %s1781_s5, %s1592_s28 }
  0x32   : > { %v1655_v1 = vld [vmem:[%s1650_s24] sm:$0xff] }
  0x33   : > { %v611_v2 = vsel %vm610_vm1, %v1655_v1, 0.0  ;;  %v1423_v4 = vpop.eup %1422 }
  0x34   : > { %612 = vadd.xlane.f32.xlu0 %v611_v2  ;;  %v615_v5 = vmul.f32 32.0, %v1423_v4  ;;  %vm619_vm2 = vweird.f32 %v1423_v4 }
  0x36   : > { %v616_v6 = vsub.f32 1.0, %v615_v5 }
  0x38   : > { %v617_v7 = vmul.f32 %v1423_v4, %v616_v6 }
  0x3a   : > { %v618_v8 = vadd.f32 %v1423_v4, %v617_v7 }
  0x3c   : > { %v1659_v9 = vsel %vm619_vm2, %v1423_v4, %v618_v8 }
  0xa7   : > { %v613_v10 = vpop.xlane.xlu0 %612 }
  0xa8   : > { %v621_v11 = vmul.f32 %v1659_v9, %v613_v10 }
  0xaa   : > { %v622_v12 = vsub.f32 %v1655_v1, %v621_v11 }
  0xac   : > { %v623_v13 = vmul.f32 %v622_v12, %v622_v12 }
  0xae   : > { %v624_v14 = vsel %vm610_vm1, %v623_v13, 0.0 }
  0xaf   : > { %625 = vadd.xlane.f32.xlu0 %v624_v14 }
 0x122   : > { %v626_v17 = vpop.xlane.xlu0 %625 }
 0x123   : > { %v627_v18 = vmul.f32 %v626_v17, %v1659_v9 }
 0x125   : > { %v628_v19 = vadd.f32 1e-05, %v627_v18 }
 0x127   : > { %1424 = vrsqrt.f32 %v628_v19  ;;  %vm635_vm4 = vweird.f32 %v628_v19 }
 0x12d   : > { %v1425_v20 = vpop.eup %1424 }
 0x12e   : > { %v630_v21 = vmul.f32 %v1425_v20, %v628_v19  ;;  %vm636_vm3 = vweird.f32 %v1425_v20 }
 0x12f   : > { %vm637_vm5 = vmor %vm635_vm4, %vm636_vm3 }
 0x130   : > { %v631_v22 = vmul.f32 %v1425_v20, %v630_v21 }
 0x132   : > { %v632_v23 = vmul.f32 0.5, %v631_v22 }
 0x134   : > { %v633_v24 = vsub.f32 1.5, %v632_v23 }
 0x136   : > { %v634_v25 = vmul.f32 %v1425_v20, %v633_v24 }
 0x138   : > { %v638_v27 = vsel %vm637_vm5, %v1425_v20, %v634_v25 }
 0x139   : > { %v639_v28 = vmul.f32 %v638_v27, %v622_v12 }
 0x13b   : > { %v643_v30 = vmul.f32 %v1415_v26, %v639_v28 }
 0x13d   : > { %v647_v31 = vadd.f32 %v1416_v29, %v643_v30 }
 0x13f   : > { %v648_v32 = vpack.c.bf16 %v647_v31, %v647_v31 }
 0x141   : > { %1306 = vmatmul.msk.bf16.vlgmr.msra.gmra.mxu0 %vm610_vm1, %v648_v32 }
 0x1be   : > { %v677_v33 = vpop.f32.mrf.mxu0 }
 0x1bf   : > { %688 = vrot.lane.b32.xlu2 %v677_v33, %s1485_s25  ;;  %682 = vrot.lane.b32.xlu1 %v677_v33, %s1486_s22  ;;  %v691_v42 = vpack.c.bf16 %v677_v33, %v677_v33  ;;  %s1812_s22 = scalar_lea.vmem %s1783_s7, %s1592_s28 }
 0x1c1   : > { %v696_v46 = vunpack.c.l.b16 %v691_v42 }
 0x1c3   : > { %v1683_v49 = vpack.c.b16 %v696_v46, %v696_v46 }
 0x1c6   : > { %v679_v34 = vpop.f32.mrf.mxu0 }
 0x1c7   : > { %685 = vrot.lane.b32.xlu1 %v677_v33, %s1487_s30 }
 0x219   : > { %v689_v35 = vpop.permute.xlu2 %688 }
 0x21a   : > { %v694_v36 = vpack.c.bf16 %v689_v35, %v689_v35 }
 0x21c   : > { %v769_v37 = vunpack.c.l.b16 %v694_v36 }
 0x21e   : > { %v1678_v38 = vpack.c.b16 %v769_v37, %v769_v37 }
 0x220   : > { %771 = vrot.lane.b32.xlu1 %v1678_v38, %s1488_s13 }
 0x231   : > { %v683_v39 = vpop.permute.xlu1 %682 }
 0x232   : > { %v692_v40 = vpack.c.bf16 %v683_v39, %v683_v39 }
 0x234   : > { %v721_v41 = vunpack.c.l.b16 %v692_v40 }
 0x236   : > { %v722_v43 = vpack.c.b16 %v721_v41, %v721_v41 }
 0x238   : > { %723 = vrot.lane.b32.xlu2 %v722_v43, %s1488_s13 }
 0x239   : > { %v686_v44 = vpop.permute.xlu1 %685 }
 0x23a   : > { %v693_v45 = vpack.c.bf16 %v686_v44, %v686_v44 }
 0x23c   : > { %v745_v47 = vunpack.c.l.b16 %v693_v45 }
 0x23e   : > { %v1681_v48 = vpack.c.b16 %v745_v47, %v745_v47 }
 0x240   : > { %747 = vrot.lane.b32.xlu0 %v1681_v48, %s1488_s13  ;;  %698 = vrot.lane.b32.xlu2 %v1683_v49, %s1488_s13 }
 0x292   : > { %v724_v50 = vpop.permute.xlu2 %723  ;;  %v772_v51 = vpop.permute.xlu1 %771 }
 0x293   : > { %v729_v52 = vsel %vm700_vm6, %v724_v50, 0  ;;  %v777_v53 = vsel %vm700_vm6, %v772_v51, 0 }
 0x294   : > { %738 = vmatpush.bf16.xpose.msra.mxu2 %v729_v52  ;;  %786 = vmatpush.bf16.xpose.msrb.mxu0 %v777_v53 }
 0x29a   : > { %v699_v54 = vpop.permute.xlu2 %698 }
 0x29b   : > { %1308 = vmatmul.msk.bf16.vlgmr.msra.gmra.mxu2 %vm700_vm6, %v692_v40  ;;  %1310 = vmatmul.msk.bf16.vlgmr.msrb.gmra.mxu0 %vm700_vm6, %v694_v36  ;;  %v705_v55 = vsel %vm700_vm6, %v699_v54, 0 }
 0x29c   : > { %714 = vmatpush.bf16.xpose.msra.mxu1 %v705_v55 }
 0x2a3   : > { %1307 = vmatmul.msk.bf16.vlgmr.msra.gmra.mxu1 %vm700_vm6, %v691_v42 }
 0x2b2   : > { %v748_v56 = vpop.permute.xlu0 %747 }
 0x2b3   : > { %v753_v57 = vsel %vm700_vm6, %v748_v56, 0 }
 0x2b4   : > { %762 = vmatpush.bf16.xpose.msra.mxu3 %v753_v57 }
 0x2bb   : > { %1309 = vmatmul.msk.bf16.vlgmr.msra.gmra.mxu3 %vm700_vm6, %v693_v45 }
 0x318   : > { %v788_v58 = vpop.f32.mrf.mxu0 }
 0x319   : > { %v801_v59 = vsel %vm700_vm6, %v788_v58, -inf }
 0x31a   : > { %802 = vmax.xlane.f32.xlu0 %v801_v59 }
 0x31e   : > { %v740_v60 = vpop.f32.mrf.mxu2 }
 0x31f   : > { %v795_v61 = vsel %vm700_vm6, %v740_v60, -inf }
 0x320   : > { %796 = vmax.xlane.f32.xlu1 %v795_v61  ;;  %v716_v62 = vpop.f32.mrf.mxu1  ;;  %v790_v63 = vpop.f32.mrf.mxu0  ;;  %v1358_v61 = vld [vmem:[%s1810_s16] sm:$0xff] }
 0x321   : > { %v792_v6 = vsel %vm700_vm6, %v716_v62, -inf }
 0x326   : > { %v742_v0 = vpop.f32.mrf.mxu2 }
 0x328   : > { %v718_v2 = vpop.f32.mrf.mxu1 }
 0x32e   : > { %862 = vrot.lane.b32.xlu0 %v722_v43, %s1489_s17 }
 0x33e   : > { %v764_v3 = vpop.f32.mrf.mxu3 }
 0x33f   : > { %v798_v4 = vsel %vm700_vm6, %v764_v3, -inf }
 0x340   : > { %799 = vmax.xlane.f32.xlu2 %v798_v4 }
 0x346   : > { %v766_v5 = vpop.f32.mrf.mxu3 }
 0x348   : > { %793 = vmax.xlane.f32.xlu2 %v792_v6  ;;  %v1417_v6 = vld [vmem:[%s1811_s29] ss:$0 sm:$0xff] }
 0x38d   : > { %v803_v7 = vpop.xlane.xlu0 %802 }
 0x38e   : > { %v807_v8 = vsub.f32 %v788_v58, %v803_v7 }
 0x390   : > { %v814_v10 = vmul.f32 1.442695, %v807_v8 }
 0x392   : > { %1426 = vpow2.f32 %v814_v10 }
 0x393   : > { %v797_v11 = vpop.xlane.xlu1 %796 }
 0x394   : > { %v805_v12 = vsub.f32 %v740_v60, %v797_v11  ;;  %v1359_v60 = vld [vmem:[%s1810_s16 + $0x8] sm:$0xff] }
 0x396   : > { %v810_v13 = vmul.f32 1.442695, %v805_v12 }
 0x398   : > { %v1427_v14 = vpop.eup %1426  ;;  %1428 = vpow2.f32 %v810_v13 }
 0x399   : > { %v825_v15 = vsel %vm700_vm6, %v1427_v14, 0.0 }
 0x39a   : > { %826 = vadd.xlane.f32.xlu1 %v825_v15 }
 0x39e   : > { %v1429_v16 = vpop.eup %1428 }
 0x39f   : > { %v819_v18 = vsel %vm700_vm6, %v1429_v16, 0.0 }
 0x3a0   : > { %v863_v17 = vpop.permute.xlu0 %862 }
 0x3a1   : > { %v868_v19 = vsel %vm845_vm7, %v863_v17, 0 }
 0x3a2   : > { %820 = vadd.xlane.f32.xlu1 %v819_v18  ;;  %877 = vmatpush.bf16.msrb.mxu2 %v868_v19  ;;  %v1361_v18 = vld [vmem:[%s1631_s3 + $0x8] sm:$0xff]  ;;  %v1360_v19 = vld [vmem:[%s1631_s3] sm:$0xff] }
 0x3a6   : > { %1043 = vmatpush.bf16.msra.mxu2 %v1361_v18 }
 0x3aa   : > { %1044 = vmatpush.bf16.msra.mxu2 %v1360_v19 }
 0x3b3   : > { %v800_v20 = vpop.xlane.xlu2 %799 }
 0x3b4   : > { %v806_v21 = vsub.f32 %v764_v3, %v800_v20  ;;  %v1365_v20 = vld [vmem:[%s1641_s15 + $0x18] sm:$0xff] }
 0x3b6   : > { %v812_v22 = vmul.f32 1.442695, %v806_v21 }
 0x3b8   : > { %1430 = vpow2.f32 %v812_v22  ;;  %v1364_v22 = vld [vmem:[%s1641_s15 + $0x10] sm:$0xff] }
 0x3bb   : > { %v794_v23 = vpop.xlane.xlu2 %793  ;;  %904 = vrot.lane.b32.xlu1 %v1678_v38, %s1489_s17 }
 0x3bc   : > { %v804_v24 = vsub.f32 %v716_v62, %v794_v23 }
 0x3be   : > { %v1431_v25 = vpop.eup %1430  ;;  %v808_v26 = vmul.f32 1.442695, %v804_v24 }
 0x3bf   : > { %v822_v27 = vsel %vm700_vm6, %v1431_v25, 0.0 }
 0x3c0   : > { %1432 = vpow2.f32 %v808_v26  ;;  %823 = vadd.xlane.f32.xlu2 %v822_v27 }
 0x3c6   : > { %v1433_v28 = vpop.eup %1432 }
 0x3c7   : > { %v816_v29 = vsel %vm700_vm6, %v1433_v28, 0.0 }
 0x3c8   : > { %817 = vadd.xlane.f32.xlu0 %v816_v29 }
 0x3d8   : > { %883 = vrot.lane.b32.xlu2 %v1681_v48, %s1489_s17 }
 0x3e0   : > { %840 = vrot.lane.b32.xlu2 %v1683_v49, %s1489_s17 }
 0x40d   : > { %v827_v30 = vpop.xlane.xlu1 %826 }
 0x415   : > { %v821_v31 = vpop.xlane.xlu1 %820 }
 0x416   : > { %1434 = vrcp.f32 %v821_v31 }
 0x417   : > { %1436 = vrcp.f32 %v827_v30 }
 0x41c   : > { %v1435_v32 = vpop.eup %1434 }
 0x41d   : > { %v833_v33 = vmul.f32 %v1435_v32, %v1429_v16  ;;  %v1437_v35 = vpop.eup %1436  ;;  %v1419_v32 = vld [vmem:[%s1812_s22] ss:$0 sm:$0xff] }
 0x41e   : > { %v835_v36 = vmul.f32 %v1437_v35, %v1427_v14 }
 0x41f   : > { %v837_v34 = vpack.c.bf16 %v833_v33, %v833_v33 }
 0x420   : > { %v839_v39 = vpack.c.bf16 %v835_v36, %v835_v36  ;;  %v1363_v36 = vld [vmem:[%s1641_s15 + $0x8] sm:$0xff] }
 0x421   : > { %1312 = vmatmul.msk.bf16.vlgmr.msrb.gmra.mxu2 %vm700_vm6, %v837_v34 }
 0x42d   : > { %v905_v37 = vpop.permute.xlu1 %904 }
 0x42e   : > { %v910_v38 = vsel %vm845_vm7, %v905_v37, 0  ;;  %v1362_v37 = vld [vmem:[%s1641_s15] sm:$0xff] }
 0x42f   : > { %919 = vmatpush.bf16.msra.mxu0 %v910_v38  ;;  %v1420_v38 = vld [vmem:[%s586_s4] ss:$0 sm:$0xff] }
 0x432   : > { %1314 = vmatmul.msk.bf16.vlgmr.msra.gmra.mxu0 %vm700_vm6, %v839_v39 }
 0x433   : > { %v824_v40 = vpop.xlane.xlu2 %823 }
 0x434   : > { %1438 = vrcp.f32 %v824_v40 }
 0x43a   : > { %v1439_v41 = vpop.eup %1438 }
 0x43b   : > { %v834_v42 = vmul.f32 %v1439_v41, %v1431_v25  ;;  %v884_v43 = vpop.permute.xlu2 %883  ;;  %v818_v44 = vpop.xlane.xlu0 %817 }
 0x43c   : > { %1440 = vrcp.f32 %v818_v44  ;;  %v889_v45 = vsel %vm845_vm7, %v884_v43, 0  ;;  %v1421_v44 = vld [vmem:[%s594_s20] ss:$0 sm:$0xff] }
 0x43d   : > { %898 = vmatpush.bf16.msrb.mxu3 %v889_v45  ;;  %v838_v46 = vpack.c.bf16 %v834_v42, %v834_v42 }
 0x440   : > { %1313 = vmatmul.msk.bf16.vlgmr.msrb.gmra.mxu3 %vm700_vm6, %v838_v46 }
 0x441   : > { %1096 = vmatpush.bf16.msra.mxu3 %v1365_v20 }
 0x442   : > { %v1441_v47 = vpop.eup %1440 }
 0x443   : > { %v832_v48 = vmul.f32 %v1441_v47, %v1433_v28  ;;  %v841_v49 = vpop.permute.xlu2 %840 }
 0x444   : > { %v847_v50 = vsel %vm845_vm7, %v841_v49, 0 }
 0x445   : > { %v836_v51 = vpack.c.bf16 %v832_v48, %v832_v48  ;;  %856 = vmatpush.bf16.msrb.mxu1 %v847_v50  ;;  %1097 = vmatpush.bf16.msra.mxu3 %v1364_v22 }
 0x448   : > { %1311 = vmatmul.msk.bf16.vlgmr.msrb.gmra.mxu1 %vm700_vm6, %v836_v51 }
 0x449   : > { %968 = vmatpush.bf16.msra.mxu1 %v1359_v60  ;;  %1098 = vmatpush.bf16.msra.mxu3 %v1363_v36 }
 0x44d   : > { %969 = vmatpush.bf16.msra.mxu1 %v1358_v61  ;;  %1099 = vmatpush.bf16.msra.mxu3 %v1362_v37 }
 0x4a4   : > { %v879_v52 = vpop.f32.mrf.mxu2 }
 0x4a5   : > { %926 = vrot.lane.b32.xlu1 %v879_v52, %s1490_s19 }
 0x4ac   : > { %v881_v53 = vpop.f32.mrf.mxu2 }
 0x4af   : > { %v921_v54 = vpop.f32.mrf.mxu0 }
 0x4b0   : > { %934 = vrot.lane.b32.xlu1 %v921_v54, %s1491_s27 }
 0x4b7   : > { %v923_v55 = vpop.f32.mrf.mxu0 }
 0x4c3   : > { %v900_v56 = vpop.f32.mrf.mxu3 }
 0x4c4   : > { %930 = vrot.lane.b32.xlu2 %v900_v56, %s1492_s0 }
 0x4c5   : > { %v858_v57 = vpop.f32.mrf.mxu1 }
 0x4cb   : > { %v902_v58 = vpop.f32.mrf.mxu3 }
 0x4cd   : > { %v860_v59 = vpop.f32.mrf.mxu1 }
 0x517   : > { %v927_v62 = vpop.permute.xlu1 %926 }
 0x518   : > { %v937_v0 = vsel %vm700_vm6, %v858_v57, %v927_v62 }
 0x51e   : > { %v931_v63 = vpop.permute.xlu2 %930 }
 0x51f   : > { %v939_v2 = vsel %vm938_vm8, %v937_v0, %v931_v63 }
 0x522   : > { %v935_v3 = vpop.permute.xlu1 %934 }
 0x523   : > { %v941_v4 = vsel %vm940_vm9, %v939_v2, %v935_v3 }
 0x524   : > { %v942_v5 = vpack.c.bf16 %v941_v4, %v941_v4 }
 0x526   : > { %1323 = vmatmul.msk.bf16.vlgmr.msra.gmra.mxu1 %vm610_vm1, %v942_v5 }
 0x5a3   : > { %v971_v7 = vpop.f32.mrf.mxu1 }
 0x5a4   : > { %v975_v8 = vadd.f32 %v971_v7, %v1655_v1 }
 0x5a6   : > { %v980_v10 = vadd.f32 %v1417_v6, %v975_v8 }
 0x5a8   : > { %v983_v11 = vsel %vm610_vm1, %v980_v10, 0.0 }
 0x5a9   : > { %984 = vadd.xlane.f32.xlu2 %v983_v11 }
 0x5ab   : > { %v973_v12 = vpop.f32.mrf.mxu1 }
 0x61c   : > { %v985_v13 = vpop.xlane.xlu2 %984 }
 0x61d   : > { %v986_v14 = vmul.f32 %v985_v13, %v1659_v9 }
 0x61f   : > { %v987_v15 = vsub.f32 %v980_v10, %v986_v14 }
 0x621   : > { %v988_v16 = vmul.f32 %v987_v15, %v987_v15 }
 0x623   : > { %v989_v17 = vsel %vm610_vm1, %v988_v16, 0.0 }
 0x624   : > { %990 = vadd.xlane.f32.xlu1 %v989_v17 }
 0x697   : > { %v991_v1 = vpop.xlane.xlu1 %990 }
 0x698   : > { %v992_v21 = vmul.f32 %v991_v1, %v1659_v9  ;;  %v1418_v9 = vld [vmem:[%s575_s18] ss:$0 sm:$0xff] }
 0x69a   : > { %v993_v23 = vadd.f32 1e-05, %v992_v21 }
 0x69c   : > { %1442 = vrsqrt.f32 %v993_v23  ;;  %vm1000_vm11 = vweird.f32 %v993_v23 }
 0x6a2   : > { %v1443_v24 = vpop.eup %1442 }
 0x6a3   : > { %v995_v25 = vmul.f32 %v1443_v24, %v993_v23  ;;  %vm1001_vm10 = vweird.f32 %v1443_v24 }
 0x6a4   : > { %vm1002_vm12 = vmor %vm1000_vm11, %vm1001_vm10 }
 0x6a5   : > { %v996_v26 = vmul.f32 %v1443_v24, %v995_v25 }
 0x6a7   : > { %v997_v27 = vmul.f32 0.5, %v996_v26 }
 0x6a9   : > { %v998_v28 = vsub.f32 1.5, %v997_v27 }
 0x6ab   : > { %v999_v29 = vmul.f32 %v1443_v24, %v998_v28 }
 0x6ad   : > { %v1003_v30 = vsel %vm1002_vm12, %v1443_v24, %v999_v29 }
 0x6ae   : > { %v1004_v31 = vmul.f32 %v1003_v30, %v987_v15 }
 0x6b0   : > { %v1008_v33 = vmul.f32 %v1418_v9, %v1004_v31 }
 0x6b2   : > { %v1012_v34 = vadd.f32 %v1419_v32, %v1008_v33 }
 0x6b4   : > { %v1013_v35 = vpack.c.bf16 %v1012_v34, %v1012_v34 }
 0x6b6   : > { %1332 = vmatmul.msk.bf16.vlgmr.msra.gmra.mxu2 %vm610_vm1, %v1013_v35 }
 0x739   : > { %v1046_v39 = vpop.f32.mrf.mxu2 }
 0x73a   : > { %v1047_v40 = vadd.f32 %v1420_v38, %v1046_v39 }
 0x73c   : > { %v1050_v41 = vmax.f32 %v1047_v40, 0.0 }
 0x73e   : > { %v1051_v42 = vpack.c.bf16 %v1050_v41, %v1050_v41 }
 0x740   : > { %1349 = vmatmul.msk.bf16.vlgmr.msra.gmra.mxu3 %vm1088_vm13, %v1051_v42 }
 0x741   : > { %v1048_v43 = vpop.f32.mrf.mxu2 }
 0x7c3   : > { %v1101_v45 = vpop.f32.mrf.mxu3 }
 0x7c4   : > { %v1102_v46 = vadd.f32 %v1421_v44, %v1101_v45 }
 0x7c6   : > { %v1105_v47 = vadd.f32 %v1102_v46, %v980_v10 }
 0x7c8   : > { %1106 = vst.msk [vmem:[%s1650_s24] sm:$0xff] %vm610_vm1, %v1105_v47 }
 0x7cb   : > { %v1103_v48 = vpop.f32.mrf.mxu3 }
 0x7cc PF: > { %s1813_s4 = sld [smem:[#allocation5_spill]] }
 0x7cd   : > { %s1814_s21 = sld [smem:[#allocation3_spill]] }
 0x7ce   : > { %s1815_s22 = sld [smem:[#allocation4_spill]] }
 0x7cf   : > { %s1816_s23 = sld [smem:[#allocation6_spill]] }
 0x7d0   : > { %s1817_s24 = sld [smem:[#allocation7_spill]] }
 0x7d2   : > { %s22_s25 = sadd.s32 1, %s1813_s4  }
 0x7d3   : > { %p19_p8 = scmp.ge.s32.totalorder %s22_s25, 6  }
 0x7d5   :  { %21 = sbr.rel (!%p19_p8) target bundleno = 4 (0x4), region = 135 }

</bundles_post_ra>
